<compile_context>
chip_gen: v6e
topology: v6e:2x2x1
jax: 0.10.0
libtpu: 0.0.40
codegen_flags: <defaults>
</compile_context>

<pallas_src>
import jax
import jax.numpy as jnp
from jax.experimental import pallas as pl
from jax.experimental.pallas import tpu as pltpu

EPS = 1e-6  # cirtorch L2N default


def l2n_triplet_kernel(x1_ref, x2_ref, x3_ref, o1_ref, o2_ref, o3_ref):
    """Each ref is a (row_tile, D) tile; all three branches handled per step."""

    def _l2n(x_ref, o_ref):
        x = x_ref[...].astype(jnp.float32)                             # (tb, D)
        nrm = jnp.sqrt(jnp.sum(x * x, axis=-1, keepdims=True)) + EPS   # (tb, 1)
        # Reciprocal on the narrow column (exact, keeps 1e-5 tolerance), then a
        # single broadcast multiply instead of a full-tile division.
        inv = pl.reciprocal(nrm, approx=False)
        o_ref[...] = (x * inv).astype(o_ref.dtype)

    _l2n(x1_ref, o1_ref)
    _l2n(x2_ref, o2_ref)
    _l2n(x3_ref, o3_ref)


def _round_up(x, m):
    return ((x + m - 1) // m) * m


def _choose_row_tile(B, D, itemsize):
    """Pick a row tile that (a) wastes no work at small B, (b) gives >=2 grid
    steps for megacore when B > 8, and (c) fits every generation's VMEM budget."""
    # 3 inputs + 3 outputs, each double-buffered by the BlockSpec pipeline.
    bytes_per_row = 12 * D * itemsize
    budget = 12 * 1024 * 1024  # headroom under v5e's 16 MiB scoped default
    vmem_rows = max(8, (budget // bytes_per_row) // 8 * 8)

    if B <= 8:
        tile = 8
    else:
        # ceil(B/2) rounded to the sublane floor -> at least 2 grid steps so
        # both v7x TensorCores issue DMAs; cap at 1024 rows (beyond ~1-2 MiB
        # per block the HBM roofline stops improving).
        half = _round_up(-(-B // 2), 8)
        tile = min(1024, half)
    return max(8, min(tile, vmem_rows))


def triplet_forward(f1, f2, f3, *, row_tile=None):
    """f1/f2/f3: (B, D) backbone descriptors. Returns the L2-normalized triple."""
    assert f1.shape == f2.shape == f3.shape, "triplet branches must match"
    assert f1.dtype == f2.dtype == f3.dtype, "triplet branches must share dtype"
    B, D = f1.shape
    itemsize = jnp.dtype(f1.dtype).itemsize
    if row_tile is None:
        row_tile = _choose_row_tile(B, D, itemsize)

    grid = (pl.cdiv(B, row_tile),)  # partial boundary tile handled by Pallas
    spec = pl.BlockSpec((row_tile, D), lambda i: (i, 0))
    out_shape = jax.ShapeDtypeStruct((B, D), f1.dtype)

    cost = pl.CostEstimate(
        flops=3 * 3 * B * D,                    # square + reduce + scale, x3 branches
        transcendentals=6 * B,                  # sqrt + reciprocal per row per branch
        bytes_accessed=3 * 2 * B * D * itemsize,
    )

    return pl.pallas_call(
        l2n_triplet_kernel,
        grid=grid,
        in_specs=[spec, spec, spec],
        out_specs=[spec, spec, spec],
        out_shape=(out_shape, out_shape, out_shape),
        compiler_params=pltpu.CompilerParams(
            dimension_semantics=("parallel",),  # row tiles independent -> megacore
        ),
        cost_estimate=cost,
    )(f1, f2, f3)


if __name__ == "__main__":
    # Small synthetic shapes: B=2 descriptors of dim D=512 (multiple of 128 so
    # loads/stores are lane-dense).
    B, D = 2, 512
    key = jax.random.PRNGKey(0)
    k1, k2, k3 = jax.random.split(key, 3)

    # TODO(synk): synthesize backbone outputs; the real `_baselayer` CNN is
    # external to this module and not translated here.
    f1 = jax.random.normal(k1, (B, D), jnp.float32)
    f2 = jax.random.normal(k2, (B, D), jnp.float32)
    f3 = jax.random.normal(k3, (B, D), jnp.float32)

    y1, y2, y3 = triplet_forward(f1, f2, f3)
    jax.block_until_ready((y1, y2, y3))

    # Plain-JAX reference: L2N(x) = x / (||x||_2 over dim=1 + eps)
    def ref(x):
        return x / (jnp.linalg.norm(x, axis=1, keepdims=True) + EPS)

    assert y1.shape == (B, D) and y2.shape == (B, D) and y3.shape == (B, D)
    assert jnp.allclose(y1, ref(f1), atol=1e-5, rtol=1e-5)
    assert jnp.allclose(y2, ref(f2), atol=1e-5, rtol=1e-5)
    assert jnp.allclose(y3, ref(f3), atol=1e-5, rtol=1e-5)

    print("KERNEL_OK")
</pallas_src>

<mosaic_0001>
module attributes {stable_mosaic.version = 11 : i64} {
  func.func @l2n_triplet_kernel(%arg0: i32, %arg1: memref<8x512xf32, #tpu.memory_space<vmem>>, %arg2: memref<8x512xf32, #tpu.memory_space<vmem>>, %arg3: memref<8x512xf32, #tpu.memory_space<vmem>>, %arg4: memref<8x512xf32, #tpu.memory_space<vmem>>, %arg5: memref<8x512xf32, #tpu.memory_space<vmem>>, %arg6: memref<8x512xf32, #tpu.memory_space<vmem>>) attributes {dimension_semantics = [#tpu.dimension_semantics<parallel>], iteration_bounds = array<i64: 1>, scalar_prefetch = 0 : i64, scratch_operands = 0 : i64, tpu.core_type = #tpu.core_type<tc>, window_params = [{transform_indices = @transform_0, window_bounds = array<i64: 8, 512>}, {transform_indices = @transform_1, window_bounds = array<i64: 8, 512>}, {transform_indices = @transform_2, window_bounds = array<i64: 8, 512>}, {transform_indices = @transform_3, window_bounds = array<i64: 8, 512>}, {transform_indices = @transform_4, window_bounds = array<i64: 8, 512>}, {transform_indices = @transform_5, window_bounds = array<i64: 8, 512>}]} {
    %c0 = arith.constant 0 : index
    %c0_0 = arith.constant 0 : index
    %0 = vector.load %arg1[%c0, %c0_0] : memref<8x512xf32, #tpu.memory_space<vmem>>, vector<8x512xf32>
    %1 = arith.mulf %0, %0 : vector<8x512xf32>
    %cst = arith.constant dense<0.000000e+00> : vector<8xf32>
    %2 = vector.multi_reduction <add>, %1, %cst [1] : vector<8x512xf32> to vector<8xf32>
    %3 = vector.shape_cast %2 : vector<8xf32> to vector<8x1xf32>
    %4 = math.sqrt %3 : vector<8x1xf32>
    %cst_1 = arith.constant 9.99999997E-7 : f32
    %5 = vector.broadcast %cst_1 : f32 to vector<8x1xf32>
    %6 = arith.addf %4, %5 : vector<8x1xf32>
    %7 = tpu.reciprocal %6 : vector<8x1xf32> -> vector<8x1xf32>
    %8 = vector.broadcast %7 : vector<8x1xf32> to vector<8x512xf32>
    %9 = arith.mulf %0, %8 : vector<8x512xf32>
    %c0_2 = arith.constant 0 : index
    %c0_3 = arith.constant 0 : index
    %10 = vector.load %arg4[%c0_2, %c0_3] : memref<8x512xf32, #tpu.memory_space<vmem>>, vector<8x512xf32>
    tpu.vector_store %arg4[%c0_2, %c0_3], %9 {strides = array<i32>} : memref<8x512xf32, #tpu.memory_space<vmem>>, vector<8x512xf32>,
    %c0_4 = arith.constant 0 : index
    %c0_5 = arith.constant 0 : index
    %11 = vector.load %arg2[%c0_4, %c0_5] : memref<8x512xf32, #tpu.memory_space<vmem>>, vector<8x512xf32>
    %12 = arith.mulf %11, %11 : vector<8x512xf32>
    %cst_6 = arith.constant dense<0.000000e+00> : vector<8xf32>
    %13 = vector.multi_reduction <add>, %12, %cst_6 [1] : vector<8x512xf32> to vector<8xf32>
    %14 = vector.shape_cast %13 : vector<8xf32> to vector<8x1xf32>
    %15 = math.sqrt %14 : vector<8x1xf32>
    %cst_7 = arith.constant 9.99999997E-7 : f32
    %16 = vector.broadcast %cst_7 : f32 to vector<8x1xf32>
    %17 = arith.addf %15, %16 : vector<8x1xf32>
    %18 = tpu.reciprocal %17 : vector<8x1xf32> -> vector<8x1xf32>
    %19 = vector.broadcast %18 : vector<8x1xf32> to vector<8x512xf32>
    %20 = arith.mulf %11, %19 : vector<8x512xf32>
    %c0_8 = arith.constant 0 : index
    %c0_9 = arith.constant 0 : index
    %21 = vector.load %arg5[%c0_8, %c0_9] : memref<8x512xf32, #tpu.memory_space<vmem>>, vector<8x512xf32>
    tpu.vector_store %arg5[%c0_8, %c0_9], %20 {strides = array<i32>} : memref<8x512xf32, #tpu.memory_space<vmem>>, vector<8x512xf32>,
    %c0_10 = arith.constant 0 : index
    %c0_11 = arith.constant 0 : index
    %22 = vector.load %arg3[%c0_10, %c0_11] : memref<8x512xf32, #tpu.memory_space<vmem>>, vector<8x512xf32>
    %23 = arith.mulf %22, %22 : vector<8x512xf32>
    %cst_12 = arith.constant dense<0.000000e+00> : vector<8xf32>
    %24 = vector.multi_reduction <add>, %23, %cst_12 [1] : vector<8x512xf32> to vector<8xf32>
    %25 = vector.shape_cast %24 : vector<8xf32> to vector<8x1xf32>
    %26 = math.sqrt %25 : vector<8x1xf32>
    %cst_13 = arith.constant 9.99999997E-7 : f32
    %27 = vector.broadcast %cst_13 : f32 to vector<8x1xf32>
    %28 = arith.addf %26, %27 : vector<8x1xf32>
    %29 = tpu.reciprocal %28 : vector<8x1xf32> -> vector<8x1xf32>
    %30 = vector.broadcast %29 : vector<8x1xf32> to vector<8x512xf32>
    %31 = arith.mulf %22, %30 : vector<8x512xf32>
    %c0_14 = arith.constant 0 : index
    %c0_15 = arith.constant 0 : index
    %32 = vector.load %arg6[%c0_14, %c0_15] : memref<8x512xf32, #tpu.memory_space<vmem>>, vector<8x512xf32>
    tpu.vector_store %arg6[%c0_14, %c0_15], %31 {strides = array<i32>} : memref<8x512xf32, #tpu.memory_space<vmem>>, vector<8x512xf32>,
    return
  }
  func.func @transform_0(%arg0: i32) -> (i32, i32) {
    %c0_i32 = arith.constant 0 : i32
    %c0_i32_0 = arith.constant 0 : i32
    return %arg0, %c0_i32 : i32, i32
  }
  func.func @transform_1(%arg0: i32) -> (i32, i32) {
    %c0_i32 = arith.constant 0 : i32
    %c0_i32_0 = arith.constant 0 : i32
    return %arg0, %c0_i32 : i32, i32
  }
  func.func @transform_2(%arg0: i32) -> (i32, i32) {
    %c0_i32 = arith.constant 0 : i32
    %c0_i32_0 = arith.constant 0 : i32
    return %arg0, %c0_i32 : i32, i32
  }
  func.func @transform_3(%arg0: i32) -> (i32, i32) {
    %c0_i32 = arith.constant 0 : i32
    %c0_i32_0 = arith.constant 0 : i32
    return %arg0, %c0_i32 : i32, i32
  }
  func.func @transform_4(%arg0: i32) -> (i32, i32) {
    %c0_i32 = arith.constant 0 : i32
    %c0_i32_0 = arith.constant 0 : i32
    return %arg0, %c0_i32 : i32, i32
  }
  func.func @transform_5(%arg0: i32) -> (i32, i32) {
    %c0_i32 = arith.constant 0 : i32
    %c0_i32_0 = arith.constant 0 : i32
    return %arg0, %c0_i32 : i32, i32
  }
}

</mosaic_0001>

<bundles_post_ra>
// kernel: tpu_custom_call.1
= control target key start
LH: loop header
LB: loop body
LE: loop exit
PB: predicated region body
PF: predicated region fallthrough
CT: control target
= control target key end

     0   :  { %11 = vsyncpa [#allocation3], 0  ;;  %s729_s0 = inlined_call_operand.hbm [shape: f32[2,512], index: 0, kind: input, shape index: {}]   ;;  %s730_s1 = inlined_call_operand.hbm [shape: f32[2,512], index: 1, kind: input, shape index: {}]   ;;  %s731_s2 = inlined_call_operand.hbm [shape: f32[2,512], index: 2, kind: input, shape index: {}]   ;;  %s732_s3 = inlined_call_operand.hbm [shape: f32[2,512], index: 3, kind: output, shape index: {0}]   ;;  %s733_s4 = inlined_call_operand.hbm [shape: f32[2,512], index: 4, kind: output, shape index: {1}]   ;;  %s734_s5 = inlined_call_operand.hbm [shape: f32[2,512], index: 5, kind: output, shape index: {2}]  }
   0x1   :  { %12 = vsyncpa [#allocation6], 0 }
   0x2   :  { %13 = vsyncpa [#allocation4], 0 }
   0x3   :  { %14 = vsyncpa [#allocation10], 0 }
   0x4   :  { %19 = vsyncadd [#allocation3], 384  ;;  %s583_s18 = smov [#allocation2]  }
   0x5   :  { %s20_s19 = sshll.u32 %s583_s18, 4  ;;  %s21_s19 = int_to_ptr.vmem [resolvable:$true] %s20_s19 }
   0x6   :  { %s463_s20 = scalar_lea.vmem %s21_s19, 128  ;;  %s467_s21 = scalar_lea.vmem %s21_s19, 512 }
   0x7   :  { %p464_p0 = scmp.ne.s32.totalorder %s21_s19, %s463_s20  ;;  %p468_p1 = scmp.lt.s32.totalorder %s21_s19, %s21_s19 }
   0x8   :  { %p469_p2 = scmp.lt.s32.totalorder %s467_s21, %s463_s20 }
   0xa   :  { %p470_p3 = por %p469_p2, %p468_p1 }
   0xc   :  { %p471_p4 = pnand %p470_p3, %p464_p0 }
   0xe   :  { %474 = shalt.err (!%p471_p4)
}
   0xf   :  { %s584_s22 = smov 128   ;;  %s585_s23 = smov 8  }
  0x10   :  { %26 = dma.hbm_to_vmem [thread:$0]  %s729_s0, 128, %s21_s19, [#allocation3], %s584_s22, %s584_s22, %s585_s23  }
  0x11   :  { %31 = vsyncadd [#allocation6], 384  ;;  %s586_s26 = smov [#allocation5]  }
  0x12   :  { %s32_s27 = sshll.u32 %s586_s26, 4  ;;  %s33_s27 = int_to_ptr.vmem [resolvable:$true] %s32_s27 }
  0x13   :  { %s483_s28 = scalar_lea.vmem %s33_s27, 128  ;;  %s487_s29 = scalar_lea.vmem %s33_s27, 512 }
  0x14   :  { %p484_p5 = scmp.ne.s32.totalorder %s33_s27, %s483_s28  ;;  %p488_p6 = scmp.lt.s32.totalorder %s33_s27, %s33_s27 }
  0x15   :  { %p489_p7 = scmp.lt.s32.totalorder %s487_s29, %s483_s28 }
  0x17   :  { %p490_p8 = por %p489_p7, %p488_p6 }
  0x19   :  { %p491_p9 = pnand %p490_p8, %p484_p5 }
  0x1b   :  { %494 = shalt.err (!%p491_p9)
}
  0x1c   :  { %38 = dma.hbm_to_vmem [thread:$0]  %s730_s1, 128, %s33_s27, [#allocation6], %s584_s22, %s584_s22, %s585_s23  }
  0x1d   :  { %43 = vsyncadd [#allocation6], 384  ;;  %s587_s0 = smov [#allocation7]  }
  0x1e   :  { %s44_s7 = sshll.u32 %s587_s0, 4  ;;  %s45_s7 = int_to_ptr.vmem [resolvable:$true] %s44_s7 }
  0x1f   :  { %s503_s8 = scalar_lea.vmem %s45_s7, 128  ;;  %s507_s9 = scalar_lea.vmem %s45_s7, 512 }
  0x20   :  { %p504_p10 = scmp.ne.s32.totalorder %s45_s7, %s503_s8  ;;  %p508_p11 = scmp.lt.s32.totalorder %s45_s7, %s45_s7 }
  0x21   :  { %p509_p12 = scmp.lt.s32.totalorder %s507_s9, %s503_s8 }
  0x23   :  { %p510_p13 = por %p509_p12, %p508_p11 }
  0x25   :  { %p511_p0 = pnand %p510_p13, %p504_p10 }
  0x27   :  { %514 = shalt.err (!%p511_p0)
}
  0x28   :  { %50 = dma.hbm_to_vmem [thread:$0]  %s731_s2, 128, %s45_s7, [#allocation6], %s584_s22, %s584_s22, %s585_s23  }
  0x29   :  { %575 = dma.done.wait [#allocation3], 512  }
  0x2a   :  { %576 = vsyncadd [#allocation3], 4294966784 }
  0x2b   :  { %577 = dma.done.wait [#allocation6], 1024  }
  0x2c   :  { %578 = vsyncadd [#allocation6], 4294966272  ;;  %v79_v0 = vlaneseq  ;;  %v588_v1 = vmov 1983009808   ;;  %v646_v5 = vld [vmem:[#allocation7] sm:$0xff]  ;;  %v648_v6 = vld [vmem:[#allocation7 + $0x8] sm:$0xff] }
  0x2d   :  { %v77_v2 = vunpack.c.l.s4 %v588_v1  ;;  %v650_v7 = vld [vmem:[#allocation7 + $0x10] sm:$0xff]  ;;  %v653_v9 = vld [vmem:[#allocation7 + $0x18] sm:$0xff]  ;;  %v278_v10 = vmul.f32 %v646_v5, %v646_v5  ;;  %v279_v11 = vmul.f32 %v648_v6, %v648_v6  ;;  %v661_v13 = vld [vmem:[#allocation2] sm:$0xff] }
  0x2e   :  { %v644_v4 = vshrl.u32 %v79_v0, 7  ;;  %v280_v12 = vmul.f32 %v650_v7, %v650_v7  ;;  %v663_v14 = vld [vmem:[#allocation2 + $0x8] sm:$0xff]  ;;  %v281_v15 = vmul.f32 %v653_v9, %v653_v9  ;;  %v667_v16 = vld [vmem:[#allocation2 + $0x10] sm:$0xff]  ;;  %v669_v17 = vld [vmem:[#allocation2 + $0x18] sm:$0xff]  ;;  %v64_v18 = vmul.f32 %v661_v13, %v661_v13 }
  0x2f   :  { %v78_v3 = vunpack.c.0.s8 %v77_v2  ;;  %v65_v19 = vmul.f32 %v663_v14, %v663_v14  ;;  %v286_v20 = vcombine.low %v278_v10, %v279_v11  ;;  %v287_v21 = vcombine.high %v278_v10, %v279_v11  ;;  %v679_v28 = vld [vmem:[#allocation5] sm:$0xff]  ;;  %v681_v29 = vld [vmem:[#allocation5 + $0x8] sm:$0xff]  ;;  %v683_v40 = vld [vmem:[#allocation5 + $0x10] sm:$0xff] }
  0x30   :  { %v66_v22 = vmul.f32 %v667_v16, %v667_v16  ;;  %v67_v23 = vmul.f32 %v669_v17, %v669_v17  ;;  %v288_v24 = vcombine.low %v280_v12, %v281_v15  ;;  %v289_v25 = vcombine.high %v280_v12, %v281_v15  ;;  %v685_v41 = vld [vmem:[#allocation5 + $0x18] sm:$0xff] }
  0x31   :  { %v81_v8 = vsub.s32 %v78_v3, %v644_v4  ;;  %v72_v26 = vcombine.low %v64_v18, %v65_v19  ;;  %v73_v27 = vcombine.high %v64_v18, %v65_v19  ;;  %v171_v42 = vmul.f32 %v679_v28, %v679_v28 }
  0x32   :  { %v74_v32 = vcombine.low %v66_v22, %v67_v23  ;;  %v75_v33 = vcombine.high %v66_v22, %v67_v23  ;;  %v172_v43 = vmul.f32 %v681_v29, %v681_v29  ;;  %v173_v52 = vmul.f32 %v683_v40, %v683_v40 }
  0x33   :  { %v296_v30 = vrot.slane %v286_v20, %v81_v8  ;;  %v303_v31 = vrot.slane %v287_v21, %v81_v8  ;;  %v310_v34 = vrot.slane %v288_v24, %v81_v8  ;;  %v317_v35 = vrot.slane %v289_v25, %v81_v8 }
  0x34   :  { %v82_v36 = vrot.slane %v72_v26, %v81_v8  ;;  %v89_v37 = vrot.slane %v73_v27, %v81_v8  ;;  %v96_v38 = vrot.slane %v74_v32, %v81_v8  ;;  %v103_v39 = vrot.slane %v75_v33, %v81_v8 }
  0x35   :  { %v318_v44 = vcombine.low %v296_v30, %v310_v34  ;;  %v319_v45 = vcombine.high %v296_v30, %v310_v34  ;;  %v320_v46 = vcombine.low %v303_v31, %v317_v35  ;;  %v321_v47 = vcombine.high %v303_v31, %v317_v35 }
  0x36   :  { %v104_v48 = vcombine.low %v82_v36, %v96_v38  ;;  %v105_v49 = vcombine.high %v82_v36, %v96_v38  ;;  %v106_v50 = vcombine.low %v89_v37, %v103_v39  ;;  %v174_v53 = vmul.f32 %v685_v41, %v685_v41 }
  0x37   :  { %v326_v51 = vadd.f32 %v319_v45, %v318_v44  ;;  %v179_v54 = vcombine.low %v171_v42, %v172_v43  ;;  %v107_v55 = vcombine.high %v89_v37, %v103_v39  ;;  %v180_v57 = vcombine.high %v171_v42, %v172_v43 }
  0x38   :  { %v112_v56 = vadd.f32 %v105_v49, %v104_v48  ;;  %v181_v59 = vcombine.low %v173_v52, %v174_v53  ;;  %v182_v60 = vcombine.high %v173_v52, %v174_v53  ;;  %v589_v38 = vmov 269488144  }
  0x39   :  { %v327_v58 = vadd.f32 %v326_v51, %v320_v46  ;;  %v189_v61 = vrot.slane %v179_v54, %v81_v8  ;;  %v196_v63 = vrot.slane %v180_v57, %v81_v8  ;;  %v128_v39 = vunpack.c.l.s4 %v589_v38 }
  0x3a   :  { %v113_v62 = vadd.f32 %v112_v56, %v106_v50  ;;  %v203_v1 = vrot.slane %v181_v59, %v81_v8  ;;  %v210_v2 = vrot.slane %v182_v60, %v81_v8  ;;  %v590_v42 = vmov 842150450  }
  0x3b   :  { %v328_v0 = vadd.f32 %v327_v58, %v321_v47  ;;  %v135_v43 = vunpack.c.l.s4 %v590_v42  ;;  %v591_v44 = vmov 1414812756   ;;  %v592_v46 = vmov 1987475062  }
  0x3c   :  { %v114_v3 = vadd.f32 %v113_v62, %v107_v55  ;;  %v211_v10 = vcombine.low %v189_v61, %v203_v1  ;;  %v212_v11 = vcombine.high %v189_v61, %v203_v1  ;;  %v213_v12 = vcombine.low %v196_v63, %v210_v2 }
  0x3d   :  { %329 = vadd.xlane.f32.xlu1 %v328_v0  ;;  %v214_v15 = vcombine.high %v196_v63, %v210_v2  ;;  %v142_v45 = vunpack.c.l.s4 %v591_v44  ;;  %v149_v47 = vunpack.c.l.s4 %v592_v46  ;;  %v129_v51 = vunpack.c.0.s8 %v128_v39 }
  0x3e   :  { %115 = vadd.xlane.f32.xlu0 %v114_v3  ;;  %v219_v18 = vadd.f32 %v212_v11, %v211_v10  ;;  %v136_v53 = vunpack.c.0.s8 %v135_v43 }
  0x3f   :  { %v143_v54 = vunpack.c.0.s8 %v142_v45  ;;  %v150_v55 = vunpack.c.0.s8 %v149_v47  ;;  %v132_v57 = vsub.s32 %v129_v51, %v644_v4 }
  0x40   :  { %v220_v19 = vadd.f32 %v219_v18, %v213_v12  ;;  %v139_v58 = vsub.s32 %v136_v53, %v644_v4 }
  0x41   :  { %v146_v59 = vsub.s32 %v143_v54, %v644_v4  ;;  %v153_v60 = vsub.s32 %v150_v55, %v644_v4 }
  0x42   :  { %v221_v20 = vadd.f32 %v220_v19, %v214_v15 }
  0x44   :  { %222 = vadd.xlane.f32.xlu0 %v221_v20 }
  0xc6   :  { %v330_v21 = vpop.xlane.xlu1 %329 }
  0xc7   :  { %443 = vrsqrt.f32 %v330_v21  ;;  %v116_v22 = vpop.xlane.xlu0 %115  ;;  %vm333_vm0 = vcmp.eq.f32.partialorder %v330_v21, inf  ;;  %v336_v26 = vand.u32 2147483648, %v330_v21  ;;  %vm335_vm1 = vcmp.eq.f32.partialorder %v330_v21, 0.0 }
  0xc8   :  { %445 = vrsqrt.f32 %v116_v22  ;;  %vm119_vm2 = vcmp.eq.f32.partialorder %v116_v22, inf  ;;  %v122_v31 = vand.u32 2147483648, %v116_v22  ;;  %vm121_vm3 = vcmp.eq.f32.partialorder %v116_v22, 0.0 }
  0xcd   :  { %v223_v23 = vpop.xlane.xlu0 %222 }
  0xce   :  { %447 = vrsqrt.f32 %v223_v23  ;;  %vm226_vm4 = vcmp.eq.f32.partialorder %v223_v23, inf  ;;  %v229_v49 = vand.u32 2147483648, %v223_v23  ;;  %vm228_vm5 = vcmp.eq.f32.partialorder %v223_v23, 0.0 }
  0xd4   :  { %v444_v24 = vpop.eup %443 }
  0xd5   :  { %v446_v25 = vpop.eup %445  ;;  %v332_v8 = vmul.f32 %v444_v24, %v330_v21 }
  0xd6   :  { %v118_v27 = vmul.f32 %v446_v25, %v116_v22 }
  0xd7   :  { %v334_v30 = vsel %vm333_vm0, %v330_v21, %v332_v8 }
  0xd8   :  { %v337_v32 = vsel %vm335_vm1, %v336_v26, %v334_v30  ;;  %v120_v33 = vsel %vm119_vm2, %v116_v22, %v118_v27 }
  0xd9   :  { %v338_v34 = vadd.f32 1e-06, %v337_v32  ;;  %v123_v35 = vsel %vm121_vm3, %v122_v31, %v120_v33 }
  0xda   :  { %v124_v36 = vadd.f32 1e-06, %v123_v35 }
  0xdb   :  { %449 = vrcp.f32 %v338_v34  ;;  %v448_v37 = vpop.eup %447 }
  0xdc   :  { %451 = vrcp.f32 %v124_v36  ;;  %v225_v48 = vmul.f32 %v448_v37, %v223_v23 }
  0xde   :  { %v227_v50 = vsel %vm226_vm4, %v223_v23, %v225_v48 }
  0xdf   :  { %v230_v52 = vsel %vm228_vm5, %v229_v49, %v227_v50 }
  0xe0   :  { %v231_v56 = vadd.f32 1e-06, %v230_v52 }
  0xe2   :  { %453 = vrcp.f32 %v231_v56 }
  0xe8   :  { %v450_v61 = vpop.eup %449 }
  0xe9   :  { %v452_v62 = vpop.eup %451  ;;  %v347_v63 = vrot.slane %v450_v61, %v132_v57  ;;  %v354_v0 = vrot.slane %v450_v61, %v139_v58  ;;  %v361_v1 = vrot.slane %v450_v61, %v146_v59  ;;  %v368_v2 = vrot.slane %v450_v61, %v153_v60 }
  0xea   :  { %v133_v3 = vrot.slane %v452_v62, %v132_v57  ;;  %v140_v10 = vrot.slane %v452_v62, %v139_v58  ;;  %v147_v11 = vrot.slane %v452_v62, %v146_v59  ;;  %v154_v12 = vrot.slane %v452_v62, %v153_v60 }
  0xeb   :  { %v373_v15 = vmul.f32 %v347_v63, %v646_v5  ;;  %v374_v18 = vmul.f32 %v354_v0, %v648_v6  ;;  %v375_v19 = vmul.f32 %v361_v1, %v650_v7  ;;  %v376_v20 = vmul.f32 %v368_v2, %v653_v9 }
  0xec   :  { %v159_v4 = vmul.f32 %v133_v3, %v661_v13  ;;  %v160_v21 = vmul.f32 %v140_v10, %v663_v14  ;;  %v161_v22 = vmul.f32 %v147_v11, %v667_v16  ;;  %v162_v23 = vmul.f32 %v154_v12, %v669_v17 }
  0xed   :  { %377 = vst [vmem:[#allocation11] sm:$0xff] %v373_v15  ;;  %378 = vst [vmem:[#allocation11 + $0x8] sm:$0xff] %v374_v18 }
  0xee   :  { %379 = vst [vmem:[#allocation11 + $0x10] sm:$0xff] %v375_v19  ;;  %380 = vst [vmem:[#allocation11 + $0x18] sm:$0xff] %v376_v20 }
  0xef   :  { %163 = vst [vmem:[#allocation8] sm:$0xff] %v159_v4  ;;  %164 = vst [vmem:[#allocation8 + $0x8] sm:$0xff] %v160_v21  ;;  %v454_v5 = vpop.eup %453 }
  0xf0   :  { %165 = vst [vmem:[#allocation8 + $0x10] sm:$0xff] %v161_v22  ;;  %166 = vst [vmem:[#allocation8 + $0x18] sm:$0xff] %v162_v23  ;;  %v240_v6 = vrot.slane %v454_v5, %v132_v57  ;;  %v247_v7 = vrot.slane %v454_v5, %v139_v58  ;;  %v254_v9 = vrot.slane %v454_v5, %v146_v59 }
  0xf1   :  { %v261_v24 = vrot.slane %v454_v5, %v153_v60 }
  0xf2   :  { %v266_v13 = vmul.f32 %v240_v6, %v679_v28  ;;  %v267_v14 = vmul.f32 %v247_v7, %v681_v29  ;;  %v268_v16 = vmul.f32 %v254_v9, %v683_v40 }
  0xf3   :  { %v269_v17 = vmul.f32 %v261_v24, %v685_v41 }
  0xf4   :  { %270 = vst [vmem:[#allocation9] sm:$0xff] %v266_v13  ;;  %271 = vst [vmem:[#allocation9 + $0x8] sm:$0xff] %v267_v14 }
  0xf5   :  { %272 = vst [vmem:[#allocation9 + $0x10] sm:$0xff] %v268_v16  ;;  %273 = vst [vmem:[#allocation9 + $0x18] sm:$0xff] %v269_v17 }
  0xf6   :  { %385 = vsyncadd [#allocation4], 384  ;;  %s593_s1 = smov [#allocation8]  }
  0xf7   :  { %s386_s2 = sshll.u32 %s593_s1, 4  ;;  %s387_s2 = int_to_ptr.vmem [resolvable:$true] %s386_s2 }
  0xf8   :  { %s515_s12 = scalar_lea.vmem %s387_s2, 128  ;;  %s519_s13 = scalar_lea.vmem %s387_s2, 512 }
  0xf9   :  { %p516_p1 = scmp.ne.s32.totalorder %s387_s2, %s515_s12  ;;  %p520_p2 = scmp.lt.s32.totalorder %s387_s2, %s387_s2 }
  0xfa   :  { %p521_p3 = scmp.lt.s32.totalorder %s519_s13, %s515_s12 }
  0xfc   :  { %p522_p4 = por %p521_p3, %p520_p2 }
  0xfe   :  { %p523_p5 = pnand %p522_p4, %p516_p1 }
 0x100   :  { %526 = shalt.err (!%p523_p5)
}
 0x101   :  { %392 = dma.vmem_to_hbm [thread:$0]  %s387_s2, 128, %s732_s3, [#allocation4], %s584_s22, %s584_s22, %s585_s23  }
 0x102   :  { %397 = vsyncadd [#allocation10], 384  ;;  %s594_s16 = smov [#allocation9]  }
 0x103   :  { %s398_s17 = sshll.u32 %s594_s16, 4  ;;  %s399_s17 = int_to_ptr.vmem [resolvable:$true] %s398_s17 }
 0x104   :  { %s535_s18 = scalar_lea.vmem %s399_s17, 128  ;;  %s539_s19 = scalar_lea.vmem %s399_s17, 512 }
 0x105   :  { %p536_p6 = scmp.ne.s32.totalorder %s399_s17, %s535_s18  ;;  %p540_p7 = scmp.lt.s32.totalorder %s399_s17, %s399_s17 }
 0x106   :  { %p541_p8 = scmp.lt.s32.totalorder %s539_s19, %s535_s18 }
 0x108   :  { %p542_p9 = por %p541_p8, %p540_p7 }
 0x10a   :  { %p543_p10 = pnand %p542_p9, %p536_p6 }
 0x10c   :  { %546 = shalt.err (!%p543_p10)
}
 0x10d   :  { %404 = dma.vmem_to_hbm [thread:$0]  %s399_s17, 128, %s733_s4, [#allocation10], %s584_s22, %s584_s22, %s585_s23  }
 0x10e   :  { %409 = vsyncadd [#allocation10], 384  ;;  %s595_s3 = smov [#allocation11]  }
 0x10f   :  { %s410_s24 = sshll.u32 %s595_s3, 4  ;;  %s411_s24 = int_to_ptr.vmem [resolvable:$true] %s410_s24 }
 0x110   :  { %s555_s25 = scalar_lea.vmem %s411_s24, 128  ;;  %s559_s26 = scalar_lea.vmem %s411_s24, 512 }
 0x111   :  { %p556_p11 = scmp.ne.s32.totalorder %s411_s24, %s555_s25  ;;  %p560_p12 = scmp.lt.s32.totalorder %s411_s24, %s411_s24 }
 0x112   :  { %p561_p13 = scmp.lt.s32.totalorder %s559_s26, %s555_s25 }
 0x114   :  { %p562_p0 = por %p561_p13, %p560_p12 }
 0x116   :  { %p563_p1 = pnand %p562_p0, %p556_p11 }
 0x118   :  { %566 = shalt.err (!%p563_p1)
}
 0x119   :  { %416 = dma.vmem_to_hbm [thread:$0]  %s411_s24, 128, %s734_s5, [#allocation10], %s584_s22, %s584_s22, %s585_s23  }
 0x11a   :  { %579 = dma.done.wait [#allocation4], 512  }
 0x11b   :  { %580 = vsyncadd [#allocation4], 4294966784 }
 0x11c   :  { %581 = dma.done.wait [#allocation10], 1024  }
 0x11d   :  { %582 = vsyncadd [#allocation10], 4294966272 }
 0x11e   :  { %426 = vsyncpa [#allocation3], 1 }
 0x11f   :  { %427 = vsyncpa [#allocation6], 1 }
 0x120   :  { %428 = vsyncpa [#allocation4], 1 }
 0x121   :  { %429 = vsyncpa [#allocation10], 1 }

</bundles_post_ra>
